<compile_context>
chip_gen: v6e
topology: v6e:2x2x1
jax: 0.10.0
libtpu: 0.0.40
codegen_flags: <defaults>
</compile_context>

<pallas_src>
import functools
import math

import jax
import jax.numpy as jnp
from jax.experimental import pallas as pl
from jax.experimental.pallas import tpu as pltpu


_VMEM_LIMIT = 32 * 1024 * 1024   # raises v5e's 16MiB default; == default on v6e/v7x.


# ----------------------------------------------------------------------------
# Helpers: padding / tile-size selection
# ----------------------------------------------------------------------------

def _rup(x, m):
    return ((x + m - 1) // m) * m


def padded_oc(oc):
    """Carry every channel count padded to a multiple of 128 (lane-dense stores,
    full MXU result columns); the padded columns hold exact zeros."""
    return max(128, _rup(oc, 128))


def pick_tm(m):
    """Row tile + padded row count for matmul-style kernels."""
    if m <= 1024:
        mp = max(8, _rup(m, 8))
        return mp, mp
    return 512, _rup(m, 512)


def pick_tn(np_, single_m_tile):
    """Output-channel tile: >=256 where possible; split when the row axis has a single
    tile so both v7x TensorCores get a parallel block."""
    if np_ <= 512:
        tn = np_
    elif np_ % 512 == 0:
        tn = 512
    else:
        tn = 256
    if single_m_tile and tn == np_ and np_ >= 256:
        tn = np_ // 2
    return tn


def pick_rows(m):
    for cand in (512, 256, 128, 64, 32, 16):
        if m % cand == 0:
            return cand
    return m


# ----------------------------------------------------------------------------
# Pallas kernels
# ----------------------------------------------------------------------------

def _mm_kernel(*refs, act, has_res):
    """One (tm,K)x(K,tn) dot per grid step (full-K weight slab resident, no reduction
    grid axis) with folded-BN bias, optional residual add and activation fused."""
    if has_res:
        a_ref, b_ref, bias_ref, res_ref, o_ref = refs
    else:
        a_ref, b_ref, bias_ref, o_ref = refs
        res_ref = None
    y = jnp.dot(a_ref[...], b_ref[...], preferred_element_type=jnp.float32)
    y = y + bias_ref[...]
    if has_res:
        y = y + res_ref[...].astype(jnp.float32)
    if act == "relu":
        y = jnp.maximum(y, 0.0)
    elif act == "sigmoid":
        y = jax.nn.sigmoid(y)
    o_ref[...] = y.astype(o_ref.dtype)


def _conv3x3_kernel(a_hbm, b_ref, bias_ref, o_ref, abuf, acc_ref, sem, *, offs, c):
    """Stride-1 3x3 conv without im2col: one halo DMA of flat padded activation rows per
    tile, then nine shifted in-VMEM slices are contracted against the resident weight
    slab (9*C, Np), accumulating in f32."""
    tm = acc_ref.shape[0]
    rows = abuf.shape[0]
    base = pl.multiple_of(pl.program_id(0) * tm, tm)
    cp = pltpu.make_async_copy(a_hbm.at[pl.ds(base, rows), :], abuf, sem)
    cp.start()
    cp.wait()
    acc_ref[...] = jnp.zeros_like(acc_ref)
    for t, off in enumerate(offs):
        acc_ref[...] += jnp.dot(abuf[off:off + tm, :],
                                b_ref[t * c:(t + 1) * c, :],
                                preferred_element_type=jnp.float32)
    y = acc_ref[...] + bias_ref[...]
    o_ref[...] = jnp.maximum(y, 0.0).astype(o_ref.dtype)


def _max9_kernel(*refs):
    """Elementwise max over 9 shifted-window inputs (3x3 stride-2 maxpool)."""
    o_ref = refs[-1]
    m = refs[0][...]
    for r in refs[1:-1]:
        m = jnp.maximum(m, r[...])
    o_ref[...] = m


def _gap_kernel(x_ref, o_ref):
    o_ref[...] = jnp.mean(x_ref[...].astype(jnp.float32),
                          axis=1, keepdims=True).astype(o_ref.dtype)


# ----------------------------------------------------------------------------
# Pallas wrappers
# ----------------------------------------------------------------------------

def matmul_bias_act(a, b_mat, bias, act, out_dtype, residual=None):
    """act(a @ b_mat + bias [+ residual]).  a:[M,K], b_mat:[K,Np], bias:[1,Np]."""
    m, k = a.shape
    kb, np_ = b_mat.shape
    assert kb == k
    tm, mp = pick_tm(m)
    tn = pick_tn(np_, mp // tm == 1)

    a = a.astype(jnp.bfloat16)
    if mp != m:
        a = jnp.pad(a, ((0, mp - m), (0, 0)))
    if residual is not None:
        residual = residual.astype(jnp.bfloat16)
        assert residual.shape == (m, np_)
        if mp != m:
            residual = jnp.pad(residual, ((0, mp - m), (0, 0)))

    in_specs = [
        pl.BlockSpec((tm, k), lambda i, j: (i, 0)),   # A streamed once per row tile
        pl.BlockSpec((k, tn), lambda i, j: (0, j)),   # full-K weight slab (VMEM-resident)
        pl.BlockSpec((1, tn), lambda i, j: (0, j)),
    ]
    inputs = [a, b_mat, bias]
    if residual is not None:
        in_specs.append(pl.BlockSpec((tm, tn), lambda i, j: (i, j)))
        inputs.append(residual)

    out = pl.pallas_call(
        functools.partial(_mm_kernel, act=act, has_res=residual is not None),
        out_shape=jax.ShapeDtypeStruct((mp, np_), out_dtype),
        grid=(mp // tm, np_ // tn),
        in_specs=in_specs,
        out_specs=pl.BlockSpec((tm, tn), lambda i, j: (i, j)),
        compiler_params=pltpu.CompilerParams(
            dimension_semantics=("parallel", "parallel"),
            vmem_limit_bytes=_VMEM_LIMIT),
    )(*inputs)
    if mp != m:
        out = out[:m]
    return out


def conv3x3_s1(x, cp):
    """3x3 / stride-1 / pad-1 conv + folded BN + ReLU, no im2col materialization.
    x: [N,H,W,C] bf16 with C a multiple of 128."""
    n, h, w, c = x.shape
    hp, wp = h + 2, w + 2
    np_ = cp["mat"].shape[1]
    assert cp["mat"].shape[0] == 9 * c

    xp = jnp.pad(x, ((0, 0), (1, 1), (1, 1), (0, 0)))
    mf = n * hp * wp
    tm, mp = pick_tm(mf)
    halo = _rup(2 * wp + 2, 8)
    # Flat padded activations; extra rows at the end keep every halo read in-bounds.
    a_flat = jnp.pad(xp.reshape(mf, c), ((0, mp + halo - mf), (0, 0)))
    offs = tuple(di * wp + dj for di in range(3) for dj in range(3))

    out = pl.pallas_call(
        functools.partial(_conv3x3_kernel, offs=offs, c=c),
        out_shape=jax.ShapeDtypeStruct((mp, np_), jnp.bfloat16),
        grid=(mp // tm,),
        in_specs=[
            pl.BlockSpec(memory_space=pl.ANY),              # flat activations stay in HBM
            pl.BlockSpec((9 * c, np_), lambda i: (0, 0)),   # weight slab, VMEM-resident
            pl.BlockSpec((1, np_), lambda i: (0, 0)),
        ],
        out_specs=pl.BlockSpec((tm, np_), lambda i: (i, 0)),
        scratch_shapes=[
            pltpu.VMEM((tm + halo, c), jnp.bfloat16),       # halo row window
            pltpu.VMEM((tm, np_), jnp.float32),             # f32 accumulator
            pltpu.SemaphoreType.DMA,
        ],
        compiler_params=pltpu.CompilerParams(
            dimension_semantics=("parallel",),
            vmem_limit_bytes=_VMEM_LIMIT),
    )(a_flat, cp["mat"], cp["bias"])

    # Keep only the valid (non-padded) output pixels.
    return out[:mf].reshape(n, hp, wp, np_)[:, :h, :w, :]


def maxpool3x3_s2(x):
    """3x3, stride 2, padding 1 max pool on NHWC input (post-ReLU activations).
    TODO(synk): the 9 strided window slices are still materialized by XLA (each is
    output-sized); a halo/element-offset Pallas read would remove that traffic."""
    n, h, w, c = x.shape
    xp = jnp.pad(x, ((0, 0), (1, 1), (1, 1), (0, 0)),
                 constant_values=-jnp.inf)
    oh = (h - 1) // 2 + 1
    ow = (w - 1) // 2 + 1
    m = n * oh * ow
    slices = []
    for i in range(3):
        for j in range(3):
            s = xp[:, i:i + 2 * (oh - 1) + 1:2, j:j + 2 * (ow - 1) + 1:2, :]
            slices.append(s.reshape(m, c))
    tm = pick_rows(m)
    out = pl.pallas_call(
        _max9_kernel,
        out_shape=jax.ShapeDtypeStruct((m, c), x.dtype),
        grid=(m // tm,),
        in_specs=[pl.BlockSpec((tm, c), lambda i: (i, 0)) for _ in range(9)],
        out_specs=pl.BlockSpec((tm, c), lambda i: (i, 0)),
        compiler_params=pltpu.CompilerParams(
            dimension_semantics=("parallel",), vmem_limit_bytes=_VMEM_LIMIT),
    )(*slices)
    return out.reshape(n, oh, ow, c)


def global_avg_pool(x):
    """x: [N,H,W,C] -> [N,C] (adaptive average pool to 1x1)."""
    n, h, w, c = x.shape
    xr = x.reshape(n, h * w, c)
    out = pl.pallas_call(
        _gap_kernel,
        out_shape=jax.ShapeDtypeStruct((n, 1, c), x.dtype),
        grid=(n,),
        in_specs=[pl.BlockSpec((1, h * w, c), lambda i: (i, 0, 0))],
        out_specs=pl.BlockSpec((1, 1, c), lambda i: (i, 0, 0)),
        compiler_params=pltpu.CompilerParams(
            dimension_semantics=("parallel",), vmem_limit_bytes=_VMEM_LIMIT),
    )(xr)
    return out.reshape(n, c)


# ----------------------------------------------------------------------------
# Conv glue
# ----------------------------------------------------------------------------

def extract_patches(x, kh, kw, stride, pad):
    """NHWC patch extraction (fallback path); returns [N,OH,OW,kh*kw*C], (kh,kw,C) order."""
    if kh == 1 and kw == 1 and pad == 0:
        return x[:, ::stride, ::stride, :]
    xp = jnp.pad(x, ((0, 0), (pad, pad), (pad, pad), (0, 0)))
    _, hh, ww, _ = xp.shape
    oh = (hh - kh) // stride + 1
    ow = (ww - kw) // stride + 1
    cols = []
    for i in range(kh):
        for j in range(kw):
            cols.append(xp[:, i:i + stride * (oh - 1) + 1:stride,
                           j:j + stride * (ow - 1) + 1:stride, :])
    return jnp.concatenate(cols, axis=-1)


def conv_act(x, cp, stride, pad, act, residual=None):
    """Fused conv + folded BN + optional residual + activation.  x: NHWC bf16.
    Output keeps padded (lane-aligned) channel count."""
    kh, kw = cp["kh"], cp["kw"]
    ocp = cp["mat"].shape[1]
    if (kh == 3 and kw == 3 and stride == 1 and pad == 1 and residual is None
            and act == "relu" and x.shape[-1] % 128 == 0):
        return conv3x3_s1(x, cp)
    # Fallback: stem 7x7, the three stride-2 3x3 convs, and all 1x1 convs.
    patches = extract_patches(x, kh, kw, stride, pad)
    n, oh, ow, k = patches.shape
    a = patches.reshape(n * oh * ow, k)
    res2d = None
    if residual is not None:
        res2d = residual.reshape(n * oh * ow, residual.shape[-1])
    y = matmul_bias_act(a, cp["mat"], cp["bias"], act=act,
                        out_dtype=jnp.bfloat16, residual=res2d)
    return y.reshape(n, oh, ow, ocp)


# ----------------------------------------------------------------------------
# ResNet-50 parameters (deterministic synthetic init, torch layout) + preparation
# ----------------------------------------------------------------------------

class KeyGen:
    def __init__(self, key):
        self.key = key

    def next(self):
        self.key, sub = jax.random.split(self.key)
        return sub


def conv_w(kg, oc, ic, kh, kw):
    fan_out = oc * kh * kw                      # kaiming_normal_(mode='fan_out')
    std = math.sqrt(2.0 / fan_out)
    return std * jax.random.normal(kg.next(), (oc, ic, kh, kw), jnp.float32)


def bn_params(c):
    return dict(gamma=jnp.ones((c,), jnp.float32),
                beta=jnp.zeros((c,), jnp.float32),
                mean=jnp.zeros((c,), jnp.float32),
                var=jnp.ones((c,), jnp.float32))


def make_bottleneck(kg, inplanes, planes, stride, downsample):
    p = dict(stride=stride)
    p["conv1_w"] = conv_w(kg, planes, inplanes, 1, 1)
    p["bn1"] = bn_params(planes)
    p["conv2_w"] = conv_w(kg, planes, planes, 3, 3)
    p["bn2"] = bn_params(planes)
    p["conv3_w"] = conv_w(kg, planes * 4, planes, 1, 1)
    p["bn3"] = bn_params(planes * 4)
    if downsample:
        p["down_w"] = conv_w(kg, planes * 4, inplanes, 1, 1)
        p["down_bn"] = bn_params(planes * 4)
    return p


def make_layer(kg, inplanes, planes, blocks, stride):
    layer = [make_bottleneck(kg, inplanes, planes, stride, True)]
    inplanes = planes * 4
    for _ in range(1, blocks):
        layer.append(make_bottleneck(kg, inplanes, planes, 1, False))
    return layer, inplanes


def init_params(key):
    kg = KeyGen(key)
    params = {}
    params["conv1_w"] = conv_w(kg, 64, 3, 7, 7)
    params["bn1"] = bn_params(64)
    layers = []
    inplanes = 64
    for planes, blocks, stride in ((64, 3, 1), (128, 4, 2),
                                   (256, 6, 2), (512, 3, 2)):
        layer, inplanes = make_layer(kg, inplanes, planes, blocks, stride)
        layers.append(layer)
    params["layers"] = layers
    bound = 1.0 / math.sqrt(2048.0)             # torch nn.Linear default init
    params["fc_w"] = jax.random.uniform(kg.next(), (1, 2048), jnp.float32,
                                        minval=-bound, maxval=bound)
    params["fc_b"] = jax.random.uniform(kg.next(), (1,), jnp.float32,
                                        minval=-bound, maxval=bound)
    return params


def prepare_conv(w, bn, in_p=None, eps=1e-5):
    """Fold eval-mode BN into the conv weight, pad input/output channels (zero rows /
    columns), reshape to a matmul operand once at init."""
    oc, ic, kh, kw = w.shape
    if in_p is None:
        in_p = ic
    scale = bn["gamma"] * jax.lax.rsqrt(bn["var"] + eps)
    bias = bn["beta"] - bn["mean"] * scale
    wt = jnp.transpose(w * scale[:, None, None, None], (2, 3, 1, 0))   # (kh,kw,ic,oc)
    if in_p != ic:
        wt = jnp.pad(wt, ((0, 0), (0, 0), (0, in_p - ic), (0, 0)))
    mat = wt.reshape(kh * kw * in_p, oc)
    ocp = padded_oc(oc)
    if ocp != oc:
        mat = jnp.pad(mat, ((0, 0), (0, ocp - oc)))
        bias = jnp.pad(bias, (0, ocp - oc))
    return dict(mat=mat.astype(jnp.bfloat16),
                bias=bias.reshape(1, -1).astype(jnp.float32),
                oc=oc, ocp=ocp, kh=kh, kw=kw)


def prepare_params(params):
    fp = {"conv1": prepare_conv(params["conv1_w"], params["bn1"], in_p=4)}  # RGB -> 4ch
    cin = fp["conv1"]["ocp"]                                               # 128 (64 real)
    layers = []
    for layer in params["layers"]:
        blks = []
        for p in layer:
            b = {"stride": p["stride"]}
            b["conv1"] = prepare_conv(p["conv1_w"], p["bn1"], in_p=cin)
            b["conv2"] = prepare_conv(p["conv2_w"], p["bn2"], in_p=b["conv1"]["ocp"])
            b["conv3"] = prepare_conv(p["conv3_w"], p["bn3"], in_p=b["conv2"]["ocp"])
            if "down_w" in p:
                b["down"] = prepare_conv(p["down_w"], p["down_bn"], in_p=cin)
            blks.append(b)
            cin = b["conv3"]["ocp"]
        layers.append(blks)
    fp["layers"] = layers

    ocp = padded_oc(1)
    mat = jnp.pad(params["fc_w"].T, ((0, 0), (0, ocp - 1)))       # (2048, 128)
    bias = jnp.pad(params["fc_b"], (0, ocp - 1))
    fp["fc"] = dict(mat=mat.astype(jnp.bfloat16),
                    bias=bias.reshape(1, -1).astype(jnp.float32), oc=1)
    return fp


# ----------------------------------------------------------------------------
# Forward pass
# ----------------------------------------------------------------------------

def bottleneck_forward(x, p):
    stride = p["stride"]
    out = conv_act(x, p["conv1"], stride=1, pad=0, act="relu")
    out = conv_act(out, p["conv2"], stride=stride, pad=1, act="relu")
    if "down" in p:
        identity = conv_act(x, p["down"], stride=stride, pad=0, act="none")
    else:
        identity = x
    # conv3 with the residual add + ReLU fused into the matmul epilogue.
    out = conv_act(out, p["conv3"], stride=1, pad=0, act="relu",
                   residual=identity)
    return out


def blur_detection_resnet_forward(fp, x_nchw):
    """Equivalent of BlurDetectionResNet.forward: sigmoid(resnet50(x)), output [N, 1]."""
    x = jnp.transpose(x_nchw, (0, 2, 3, 1)).astype(jnp.bfloat16)   # NCHW -> NHWC bf16
    x = jnp.pad(x, ((0, 0), (0, 0), (0, 0), (0, 1)))               # RGB -> 4 channels
    x = conv_act(x, fp["conv1"], stride=2, pad=3, act="relu")      # 128-wide (64 real)
    x = maxpool3x3_s2(x)
    for layer in fp["layers"]:
        for blk in layer:
            x = bottleneck_forward(x, blk)
    feat = global_avg_pool(x)                                      # [N, 2048] bf16
    out = matmul_bias_act(feat, fp["fc"]["mat"], fp["fc"]["bias"],
                          act="sigmoid", out_dtype=jnp.float32)    # [N, 128] padded
    return out[:, :fp["fc"]["oc"]]                                 # [N, 1]


# ----------------------------------------------------------------------------
# Main
# ----------------------------------------------------------------------------

if __name__ == "__main__":
    root = jax.random.PRNGKey(0)
    k_params, k_input = jax.random.split(root)

    params = init_params(k_params)
    prepared = prepare_params(params)

    # Smallest input where the ResNet-50 downsampling chain (÷32) stays valid.
    x = jax.random.normal(k_input, (2, 3, 32, 32), jnp.float32)    # NCHW like PyTorch

    y = blur_detection_resnet_forward(prepared, x)
    y = jax.block_until_ready(y)

    assert y.shape == (2, 1), y.shape
    assert y.dtype == jnp.float32
    assert bool(jnp.all((y >= 0.0) & (y <= 1.0)))
    print("KERNEL_OK")
</pallas_src>

<mosaic_0001>
module attributes {stable_mosaic.version = 11 : i64} {
  func.func @_mm_kernel(%arg0: i32, %arg1: i32, %arg2: memref<512x196xbf16, #tpu.memory_space<vmem>>, %arg3: memref<196x128xbf16, #tpu.memory_space<vmem>>, %arg4: memref<1x128xf32, #tpu.memory_space<vmem>>, %arg5: memref<512x128xbf16, #tpu.memory_space<vmem>>) attributes {dimension_semantics = [#tpu.dimension_semantics<parallel>, #tpu.dimension_semantics<parallel>], iteration_bounds = array<i64: 1, 1>, scalar_prefetch = 0 : i64, scratch_operands = 0 : i64, tpu.core_type = #tpu.core_type<tc>, window_params = [{transform_indices = @transform_0, window_bounds = array<i64: 512, 196>}, {transform_indices = @transform_1, window_bounds = array<i64: 196, 128>}, {transform_indices = @transform_2, window_bounds = array<i64: 1, 128>}, {transform_indices = @transform_3, window_bounds = array<i64: 512, 128>}]} {
    %c0 = arith.constant 0 : index
    %c0_0 = arith.constant 0 : index
    %0 = vector.load %arg2[%c0, %c0_0] : memref<512x196xbf16, #tpu.memory_space<vmem>>, vector<512x196xbf16>
    %c0_1 = arith.constant 0 : index
    %c0_2 = arith.constant 0 : index
    %1 = vector.load %arg3[%c0_1, %c0_2] : memref<196x128xbf16, #tpu.memory_space<vmem>>, vector<196x128xbf16>
    %cst = arith.constant dense<0.000000e+00> : vector<512x128xf32>
    %2 = tpu.matmul %0, %1, %cst {dimension_numbers = #tpu.dot_dimension_numbers<[1], [0], [0], [1], [0, 0, 1, 1], [], []>} : vector<512x196xbf16>, vector<196x128xbf16>, vector<512x128xf32> -> vector<512x128xf32>
    %c0_3 = arith.constant 0 : index
    %c0_4 = arith.constant 0 : index
    %3 = vector.load %arg4[%c0_3, %c0_4] : memref<1x128xf32, #tpu.memory_space<vmem>>, vector<1x128xf32>
    %4 = vector.broadcast %3 : vector<1x128xf32> to vector<512x128xf32>
    %5 = arith.addf %2, %4 : vector<512x128xf32>
    %cst_5 = arith.constant 0.000000e+00 : f32
    %6 = vector.broadcast %cst_5 : f32 to vector<512x128xf32>
    %7 = arith.maximumf %5, %6 : vector<512x128xf32>
    %8 = arith.truncf %7 : vector<512x128xf32> to vector<512x128xbf16>
    %c0_6 = arith.constant 0 : index
    %c0_7 = arith.constant 0 : index
    %9 = vector.load %arg5[%c0_6, %c0_7] : memref<512x128xbf16, #tpu.memory_space<vmem>>, vector<512x128xbf16>
    tpu.vector_store %arg5[%c0_6, %c0_7], %8 {strides = array<i32>} : memref<512x128xbf16, #tpu.memory_space<vmem>>, vector<512x128xbf16>,
    return
  }
  func.func @transform_0(%arg0: i32, %arg1: i32) -> (i32, i32) {
    %c0_i32 = arith.constant 0 : i32
    %c0_i32_0 = arith.constant 0 : i32
    return %arg0, %c0_i32 : i32, i32
  }
  func.func @transform_1(%arg0: i32, %arg1: i32) -> (i32, i32) {
    %c0_i32 = arith.constant 0 : i32
    %c0_i32_0 = arith.constant 0 : i32
    return %c0_i32, %arg1 : i32, i32
  }
  func.func @transform_2(%arg0: i32, %arg1: i32) -> (i32, i32) {
    %c0_i32 = arith.constant 0 : i32
    %c0_i32_0 = arith.constant 0 : i32
    return %c0_i32, %arg1 : i32, i32
  }
  func.func @transform_3(%arg0: i32, %arg1: i32) -> (i32, i32) {
    %c0_i32 = arith.constant 0 : i32
    return %arg0, %arg1 : i32, i32
  }
}

</mosaic_0001>

<bundles_post_ra>
// kernel: tpu_custom_call.1
= control target key start
LH: loop header
LB: loop body
LE: loop exit
PB: predicated region body
PF: predicated region fallthrough
CT: control target
= control target key end

     0   :  { %v1855_v1 = vmov 0   ;;  %vm475_vm0 = vcmask 556032   ;;  %vm572_vm1 = vcmask 1041408   ;;  %s2240_s0 = inlined_call_operand.vmem [shape: bf16[512,196], index: 0, kind: input, shape index: {}]   ;;  %s2241_s1 = inlined_call_operand.vmem [shape: bf16[196,128], index: 1, kind: input, shape index: {}]   ;;  %s2242_s2 = inlined_call_operand.vmem [shape: f32[1,128], index: 2, kind: input, shape index: {}]   ;;  %s2243_s3 = inlined_call_operand.hbm [shape: bf16[512,128], index: 3, kind: output, shape index: {}]  }
   0x1   :  { %v1724_v0 = vld [vmem:[%s2241_s1 + $0x38] sm:$0xff]   ;;  %576 = vmatprep.subr.bf16.mxu0 %v1855_v1  ;;  %1694 = vmatprep.subr.bf16.mxu1 %v1855_v1  ;;  %v1725_v2 = vld [vmem:[%s2241_s1 + $0x30] sm:$0xff]   ;;  %v1726_v3 = vld [vmem:[%s2241_s1 + $0x28] sm:$0xff]  }
   0x2   :  { %577 = vmatpush1.bf16.msra.mxu0 %v1724_v0  ;;  %1707 = vmatpush1.bf16.msra.mxu1 %v1724_v0  ;;  %v1727_v4 = vld [vmem:[%s2241_s1 + $0x20] sm:$0xff]   ;;  %v1728_v6 = vld [vmem:[%s2241_s1 + $0x18] sm:$0xff]   ;;  %v1729_v8 = vld [vmem:[%s2241_s1 + $0x10] sm:$0xff]  }
   0x3   :  { %578 = vmatprep.subr.bf16.mxu0 %v1855_v1  ;;  %1695 = vmatprep.subr.bf16.mxu1 %v1855_v1  ;;  %v1739_v5 = vld [vmem:[%s2240_s0 + $0x4] ss:$8 sps:$4 sm:$0xff]   ;;  %v1732_v11 = vld [vmem:[%s2241_s1 + $0x60] ss:$0 sps:$4 sm:$0x33]   ;;  %v1733_v13 = vld [vmem:[%s2241_s1 + $0x58] sm:$0xff]  }
   0x4   :  { %v1742_v7 = vld [vmem:[%s2240_s0 + $0x104] ss:$8 sps:$4 sm:$0xff]   ;;  %1343 = vmatprep.mubr.msk.bf16.mxu0 %vm475_vm0, %v1739_v5  ;;  %v574_v12 = vsel %vm572_vm1, %v1732_v11, 0  ;;  %v1734_v14 = vld [vmem:[%s2241_s1 + $0x50] sm:$0xff]   ;;  %v1737_v17 = vld [vmem:[%s2240_s0] ss:$8 sps:$4 sm:$0xff]  }
   0x5   :  { %1359 = vmatprep.mubr.msk.bf16.mxu1 %vm475_vm0, %v1742_v7  ;;  %v1730_v9 = vld [vmem:[%s2241_s1 + $0x8] sm:$0xff]   ;;  %v1731_v10 = vld [vmem:[%s2241_s1] sm:$0xff]   ;;  %v1743_v19 = vld [vmem:[%s2240_s0 + $0x14] ss:$8 sps:$4 sm:$0xff]  }
   0x6   :  { %579 = vmatpush1.bf16.msra.mxu0 %v1725_v2  ;;  %1708 = vmatpush1.bf16.msra.mxu1 %v1725_v2  ;;  %v1735_v15 = vld [vmem:[%s2241_s1 + $0x48] sm:$0xff]   ;;  %v1736_v16 = vld [vmem:[%s2241_s1 + $0x40] sm:$0xff]   ;;  %v1745_v20 = vld [vmem:[%s2240_s0 + $0x114] ss:$8 sps:$4 sm:$0xff]  }
   0x7   :  { %580 = vmatprep.subr.bf16.mxu0 %v1855_v1  ;;  %1696 = vmatprep.subr.bf16.mxu1 %v1855_v1  ;;  %v1740_v18 = vld [vmem:[%s2240_s0 + $0x100] ss:$8 sps:$4 sm:$0xff]  }
   0xa   :  { %581 = vmatpush1.bf16.msra.mxu0 %v1726_v3  ;;  %1709 = vmatpush1.bf16.msra.mxu1 %v1726_v3 }
   0xb   :  { %582 = vmatprep.subr.bf16.mxu0 %v1855_v1  ;;  %1697 = vmatprep.subr.bf16.mxu1 %v1855_v1 }
   0xe   :  { %583 = vmatpush1.bf16.msra.mxu0 %v1727_v4  ;;  %1710 = vmatpush1.bf16.msra.mxu1 %v1727_v4 }
   0xf   :  { %584 = vmatprep.subr.bf16.mxu0 %v1855_v1  ;;  %1698 = vmatprep.subr.bf16.mxu1 %v1855_v1 }
  0x12   :  { %585 = vmatpush1.bf16.msra.mxu0 %v1728_v6  ;;  %1711 = vmatpush1.bf16.msra.mxu1 %v1728_v6 }
  0x13   :  { %586 = vmatprep.subr.bf16.mxu0 %v1855_v1  ;;  %1699 = vmatprep.subr.bf16.mxu1 %v1855_v1 }
  0x16   :  { %587 = vmatpush1.bf16.msra.mxu0 %v1729_v8  ;;  %1712 = vmatpush1.bf16.msra.mxu1 %v1729_v8 }
  0x17   :  { %588 = vmatprep.subr.bf16.mxu0 %v1855_v1  ;;  %1700 = vmatprep.subr.bf16.mxu1 %v1855_v1 }
  0x1a   :  { %589 = vmatpush1.bf16.msra.mxu0 %v1730_v9  ;;  %1713 = vmatpush1.bf16.msra.mxu1 %v1730_v9 }
  0x1b   :  { %590 = vmatprep.subr.bf16.mxu0 %v1855_v1  ;;  %1701 = vmatprep.subr.bf16.mxu1 %v1855_v1 }
  0x1e   :  { %591 = vmatpush1.bf16.msra.mxu0 %v1731_v10  ;;  %1714 = vmatpush1.bf16.msra.mxu1 %v1731_v10 }
  0x1f   :  { %598 = vmatprep.subr.bf16.mxu0 %v1855_v1  ;;  %1702 = vmatprep.subr.bf16.mxu1 %v1855_v1 }
  0x22   :  { %599 = vmatpush2.bf16.msra.mxu0 %v574_v12  ;;  %1715 = vmatpush2.bf16.msra.mxu1 %v574_v12 }
  0x23   :  { %600 = vmatprep.subr.bf16.mxu0 %v1855_v1  ;;  %1703 = vmatprep.subr.bf16.mxu1 %v1855_v1 }
  0x26   :  { %601 = vmatpush2.bf16.msra.mxu0 %v1733_v13  ;;  %1716 = vmatpush2.bf16.msra.mxu1 %v1733_v13 }
  0x27   :  { %602 = vmatprep.subr.bf16.mxu0 %v1855_v1  ;;  %1704 = vmatprep.subr.bf16.mxu1 %v1855_v1 }
  0x2a   :  { %603 = vmatpush2.bf16.msra.mxu0 %v1734_v14  ;;  %1717 = vmatpush2.bf16.msra.mxu1 %v1734_v14 }
  0x2b   :  { %604 = vmatprep.subr.bf16.mxu0 %v1855_v1  ;;  %1705 = vmatprep.subr.bf16.mxu1 %v1855_v1 }
  0x2e   :  { %605 = vmatpush2.bf16.msra.mxu0 %v1735_v15  ;;  %1718 = vmatpush2.bf16.msra.mxu1 %v1735_v15 }
  0x2f   :  { %606 = vmatprep.subr.bf16.mxu0 %v1855_v1  ;;  %1706 = vmatprep.subr.bf16.mxu1 %v1855_v1 }
  0x32   :  { %607 = vmatpush2.bf16.msra.mxu0 %v1736_v16  ;;  %1719 = vmatpush2.bf16.msra.mxu1 %v1736_v16 }
  0x35   :  { %609 = vmatmul.mubr.bf16.vlgmr.msra.gmra.mxu0 %v1737_v17  ;;  %737 = vmatmul.mubr.bf16.vlgmr.msra.gmra.mxu1 %v1740_v18 }
  0x36   :  { %1344 = vmatprep.mubr.msk.bf16.mxu0 %vm475_vm0, %v1743_v19  ;;  %1360 = vmatprep.mubr.msk.bf16.mxu1 %vm475_vm0, %v1745_v20 }
  0x37   :  { %8 = vsyncpa [#allocation3], 0  ;;  %v1747_v21 = vld [vmem:[%s2240_s0 + $0x10] ss:$8 sps:$4 sm:$0xff]   ;;  %v1749_v23 = vld [vmem:[%s2240_s0 + $0x24] ss:$8 sps:$4 sm:$0xff]  }
  0x38   :  { %v1748_v22 = vld [vmem:[%s2240_s0 + $0x110] ss:$8 sps:$4 sm:$0xff]   ;;  %v1751_v24 = vld [vmem:[%s2240_s0 + $0x124] ss:$8 sps:$4 sm:$0xff]   ;;  %v1753_v25 = vld [vmem:[%s2240_s0 + $0x20] ss:$8 sps:$4 sm:$0xff]  }
  0x39   :  { %v1754_v26 = vld [vmem:[%s2240_s0 + $0x120] ss:$8 sps:$4 sm:$0xff]   ;;  %v1755_v27 = vld [vmem:[%s2240_s0 + $0x34] ss:$8 sps:$4 sm:$0xff]   ;;  %v1759_v29 = vld [vmem:[%s2240_s0 + $0x30] ss:$8 sps:$4 sm:$0xff]  }
  0x3a   :  { %v1757_v28 = vld [vmem:[%s2240_s0 + $0x134] ss:$8 sps:$4 sm:$0xff]   ;;  %v1760_v30 = vld [vmem:[%s2240_s0 + $0x130] ss:$8 sps:$4 sm:$0xff]   ;;  %v1761_v31 = vld [vmem:[%s2240_s0 + $0x44] ss:$8 sps:$4 sm:$0xff]  }
  0x3b   :  { %v1763_v32 = vld [vmem:[%s2240_s0 + $0x144] ss:$8 sps:$4 sm:$0xff]   ;;  %v1765_v33 = vld [vmem:[%s2240_s0 + $0x40] ss:$8 sps:$4 sm:$0xff]   ;;  %v1767_v35 = vld [vmem:[%s2240_s0 + $0x54] ss:$8 sps:$4 sm:$0xff]  }
  0x3c   :  { %v1766_v34 = vld [vmem:[%s2240_s0 + $0x140] ss:$8 sps:$4 sm:$0xff]   ;;  %v1769_v36 = vld [vmem:[%s2240_s0 + $0x154] ss:$8 sps:$4 sm:$0xff]   ;;  %v1771_v37 = vld [vmem:[%s2240_s0 + $0x50] ss:$8 sps:$4 sm:$0xff]  }
  0x3d   :  { %617 = vmatmul.mubr.bf16.gmra.mxu0 %v1747_v21  ;;  %745 = vmatmul.mubr.bf16.gmra.mxu1 %v1748_v22  ;;  %v1772_v38 = vld [vmem:[%s2240_s0 + $0x150] ss:$8 sps:$4 sm:$0xff]   ;;  %v1773_v39 = vld [vmem:[%s2240_s0 + $0x64] ss:$8 sps:$4 sm:$0xff]   ;;  %v1777_v41 = vld [vmem:[%s2240_s0 + $0x60] ss:$8 sps:$4 sm:$0xff]  }
  0x3e   :  { %1345 = vmatprep.mubr.msk.bf16.mxu0 %vm475_vm0, %v1749_v23  ;;  %1361 = vmatprep.mubr.msk.bf16.mxu1 %vm475_vm0, %v1751_v24  ;;  %v1775_v40 = vld [vmem:[%s2240_s0 + $0x164] ss:$8 sps:$4 sm:$0xff]   ;;  %v1778_v42 = vld [vmem:[%s2240_s0 + $0x160] ss:$8 sps:$4 sm:$0xff]   ;;  %v1779_v43 = vld [vmem:[%s2240_s0 + $0x74] ss:$8 sps:$4 sm:$0xff]  }
  0x3f   :  { %v1781_v44 = vld [vmem:[%s2240_s0 + $0x174] ss:$8 sps:$4 sm:$0xff]   ;;  %v1783_v45 = vld [vmem:[%s2240_s0 + $0x70] ss:$8 sps:$4 sm:$0xff]   ;;  %v1785_v47 = vld [vmem:[%s2240_s0 + $0x84] ss:$8 sps:$4 sm:$0xff]  }
  0x40   :  { %v1784_v46 = vld [vmem:[%s2240_s0 + $0x170] ss:$8 sps:$4 sm:$0xff]   ;;  %v1787_v48 = vld [vmem:[%s2240_s0 + $0x184] ss:$8 sps:$4 sm:$0xff]   ;;  %v1789_v49 = vld [vmem:[%s2240_s0 + $0x80] ss:$8 sps:$4 sm:$0xff]  }
  0x41   :  { %v1790_v50 = vld [vmem:[%s2240_s0 + $0x180] ss:$8 sps:$4 sm:$0xff]   ;;  %v1791_v51 = vld [vmem:[%s2240_s0 + $0x94] ss:$8 sps:$4 sm:$0xff]   ;;  %v1795_v53 = vld [vmem:[%s2240_s0 + $0x90] ss:$8 sps:$4 sm:$0xff]  }
  0x42   :  { %v1793_v52 = vld [vmem:[%s2240_s0 + $0x194] ss:$8 sps:$4 sm:$0xff]   ;;  %v1796_v54 = vld [vmem:[%s2240_s0 + $0x190] ss:$8 sps:$4 sm:$0xff]   ;;  %v1797_v55 = vld [vmem:[%s2240_s0 + $0xa4] ss:$8 sps:$4 sm:$0xff]  }
  0x43   :  { %v1799_v56 = vld [vmem:[%s2240_s0 + $0x1a4] ss:$8 sps:$4 sm:$0xff]   ;;  %v1801_v57 = vld [vmem:[%s2240_s0 + $0xa0] ss:$8 sps:$4 sm:$0xff]   ;;  %v1803_v59 = vld [vmem:[%s2240_s0 + $0xb4] ss:$8 sps:$4 sm:$0xff]  }
  0x44   :  { %v1802_v58 = vld [vmem:[%s2240_s0 + $0x1a0] ss:$8 sps:$4 sm:$0xff]   ;;  %v1805_v60 = vld [vmem:[%s2240_s0 + $0x1b4] ss:$8 sps:$4 sm:$0xff]   ;;  %v1807_v61 = vld [vmem:[%s2240_s0 + $0xb0] ss:$8 sps:$4 sm:$0xff]  }
  0x45   :  { %625 = vmatmul.mubr.bf16.gmra.mxu0 %v1753_v25  ;;  %753 = vmatmul.mubr.bf16.gmra.mxu1 %v1754_v26  ;;  %v1808_v62 = vld [vmem:[%s2240_s0 + $0x1b0] ss:$8 sps:$4 sm:$0xff]   ;;  %v1809_v63 = vld [vmem:[%s2240_s0 + $0xc4] ss:$8 sps:$4 sm:$0xff]   ;;  %v1813_v1 = vld [vmem:[%s2240_s0 + $0xc0] ss:$8 sps:$4 sm:$0xff]  }
  0x46   :  { %1346 = vmatprep.mubr.msk.bf16.mxu0 %vm475_vm0, %v1755_v27  ;;  %1362 = vmatprep.mubr.msk.bf16.mxu1 %vm475_vm0, %v1757_v28  ;;  %v1811_v0 = vld [vmem:[%s2240_s0 + $0x1c4] ss:$8 sps:$4 sm:$0xff]   ;;  %v1814_v2 = vld [vmem:[%s2240_s0 + $0x1c0] ss:$8 sps:$4 sm:$0xff]   ;;  %v1815_v3 = vld [vmem:[%s2240_s0 + $0xd4] ss:$8 sps:$4 sm:$0xff]  }
  0x47   :  { %v1817_v4 = vld [vmem:[%s2240_s0 + $0x1d4] ss:$8 sps:$4 sm:$0xff]   ;;  %v1819_v5 = vld [vmem:[%s2240_s0 + $0xd0] ss:$8 sps:$4 sm:$0xff]   ;;  %v1821_v7 = vld [vmem:[%s2240_s0 + $0xe4] ss:$8 sps:$4 sm:$0xff]  }
  0x48   :  { %v1820_v6 = vld [vmem:[%s2240_s0 + $0x1d0] ss:$8 sps:$4 sm:$0xff]   ;;  %v1823_v8 = vld [vmem:[%s2240_s0 + $0x1e4] ss:$8 sps:$4 sm:$0xff]   ;;  %v1825_v9 = vld [vmem:[%s2240_s0 + $0xe0] ss:$8 sps:$4 sm:$0xff]  }
  0x49   :  { %v1826_v10 = vld [vmem:[%s2240_s0 + $0x1e0] ss:$8 sps:$4 sm:$0xff]   ;;  %v1827_v11 = vld [vmem:[%s2240_s0 + $0xf4] ss:$8 sps:$4 sm:$0xff]   ;;  %v1831_v13 = vld [vmem:[%s2240_s0 + $0xf0] ss:$8 sps:$4 sm:$0xff]  }
  0x4a   :  { %v1829_v12 = vld [vmem:[%s2240_s0 + $0x1f4] ss:$8 sps:$4 sm:$0xff]   ;;  %v1832_v14 = vld [vmem:[%s2240_s0 + $0x1f0] ss:$8 sps:$4 sm:$0xff]   ;;  %v2171_v15 = vld [vmem:[%s2242_s2] ss:$0 sm:$0xff] }
  0x4b   :  { %s1856_s0 = smov [#allocation2]  }
  0x4c   :  { %s1254_s2 = sshll.u32 %s1856_s0, 4  ;;  %s1255_s2 = int_to_ptr.vmem [resolvable:$true] %s1254_s2 }
  0x4d   :  { %633 = vmatmul.mubr.bf16.gmra.mxu0 %v1759_v29  ;;  %761 = vmatmul.mubr.bf16.gmra.mxu1 %v1760_v30  ;;  %s1833_s28 = scalar_lea.vmem %s1255_s2, 4096  ;;  %p1838_p1 = scmp.lt.s32.totalorder %s1255_s2, %s1255_s2 }
  0x4e   :  { %1347 = vmatprep.mubr.msk.bf16.mxu0 %vm475_vm0, %v1761_v31  ;;  %1363 = vmatprep.mubr.msk.bf16.mxu1 %vm475_vm0, %v1763_v32  ;;  %p1834_p0 = scmp.ne.s32.totalorder %s1255_s2, %s1833_s28  ;;  %p1839_p2 = scmp.lt.s32.totalorder %s1833_s28, %s1833_s28 }
  0x50   :  { %p1840_p3 = por %p1839_p2, %p1838_p1 }
  0x52   :  { %p1841_p4 = pnand %p1840_p3, %p1834_p0 }
  0x55   :  { %641 = vmatmul.mubr.bf16.gmra.mxu0 %v1765_v33  ;;  %769 = vmatmul.mubr.bf16.gmra.mxu1 %v1766_v34 }
  0x56   :  { %1348 = vmatprep.mubr.msk.bf16.mxu0 %vm475_vm0, %v1767_v35  ;;  %1364 = vmatprep.mubr.msk.bf16.mxu1 %vm475_vm0, %v1769_v36 }
  0x5d   :  { %649 = vmatmul.mubr.bf16.gmra.mxu0 %v1771_v37  ;;  %777 = vmatmul.mubr.bf16.gmra.mxu1 %v1772_v38 }
  0x5e   :  { %1349 = vmatprep.mubr.msk.bf16.mxu0 %vm475_vm0, %v1773_v39  ;;  %1365 = vmatprep.mubr.msk.bf16.mxu1 %vm475_vm0, %v1775_v40 }
  0x65   :  { %657 = vmatmul.mubr.bf16.gmra.mxu0 %v1777_v41  ;;  %785 = vmatmul.mubr.bf16.gmra.mxu1 %v1778_v42 }
  0x66   :  { %1350 = vmatprep.mubr.msk.bf16.mxu0 %vm475_vm0, %v1779_v43  ;;  %1366 = vmatprep.mubr.msk.bf16.mxu1 %vm475_vm0, %v1781_v44 }
  0x6d   :  { %665 = vmatmul.mubr.bf16.gmra.mxu0 %v1783_v45  ;;  %793 = vmatmul.mubr.bf16.gmra.mxu1 %v1784_v46 }
  0x6e   :  { %1351 = vmatprep.mubr.msk.bf16.mxu0 %vm475_vm0, %v1785_v47  ;;  %1367 = vmatprep.mubr.msk.bf16.mxu1 %vm475_vm0, %v1787_v48 }
  0x75   :  { %673 = vmatmul.mubr.bf16.gmra.mxu0 %v1789_v49  ;;  %801 = vmatmul.mubr.bf16.gmra.mxu1 %v1790_v50 }
  0x76   :  { %1352 = vmatprep.mubr.msk.bf16.mxu0 %vm475_vm0, %v1791_v51  ;;  %1368 = vmatprep.mubr.msk.bf16.mxu1 %vm475_vm0, %v1793_v52 }
  0x7d   :  { %681 = vmatmul.mubr.bf16.gmra.mxu0 %v1795_v53  ;;  %809 = vmatmul.mubr.bf16.gmra.mxu1 %v1796_v54 }
  0x7e   :  { %1353 = vmatprep.mubr.msk.bf16.mxu0 %vm475_vm0, %v1797_v55  ;;  %1369 = vmatprep.mubr.msk.bf16.mxu1 %vm475_vm0, %v1799_v56 }
  0x85   :  { %689 = vmatmul.mubr.bf16.gmra.mxu0 %v1801_v57  ;;  %817 = vmatmul.mubr.bf16.gmra.mxu1 %v1802_v58 }
  0x86   :  { %1354 = vmatprep.mubr.msk.bf16.mxu0 %vm475_vm0, %v1803_v59  ;;  %1370 = vmatprep.mubr.msk.bf16.mxu1 %vm475_vm0, %v1805_v60 }
  0x8d   :  { %697 = vmatmul.mubr.bf16.gmra.mxu0 %v1807_v61  ;;  %825 = vmatmul.mubr.bf16.gmra.mxu1 %v1808_v62 }
  0x8e   :  { %1355 = vmatprep.mubr.msk.bf16.mxu0 %vm475_vm0, %v1809_v63  ;;  %1371 = vmatprep.mubr.msk.bf16.mxu1 %vm475_vm0, %v1811_v0 }
  0x95   :  { %705 = vmatmul.mubr.bf16.gmra.mxu0 %v1813_v1  ;;  %833 = vmatmul.mubr.bf16.gmra.mxu1 %v1814_v2 }
  0x96   :  { %1356 = vmatprep.mubr.msk.bf16.mxu0 %vm475_vm0, %v1815_v3  ;;  %1372 = vmatprep.mubr.msk.bf16.mxu1 %vm475_vm0, %v1817_v4 }
  0x9d   :  { %713 = vmatmul.mubr.bf16.gmra.mxu0 %v1819_v5  ;;  %841 = vmatmul.mubr.bf16.gmra.mxu1 %v1820_v6 }
  0x9e   :  { %1357 = vmatprep.mubr.msk.bf16.mxu0 %vm475_vm0, %v1821_v7  ;;  %1373 = vmatprep.mubr.msk.bf16.mxu1 %vm475_vm0, %v1823_v8 }
  0xa5   :  { %721 = vmatmul.mubr.bf16.gmra.mxu0 %v1825_v9  ;;  %849 = vmatmul.mubr.bf16.gmra.mxu1 %v1826_v10 }
  0xa6   :  { %1358 = vmatprep.mubr.msk.bf16.mxu0 %vm475_vm0, %v1827_v11  ;;  %1374 = vmatprep.mubr.msk.bf16.mxu1 %vm475_vm0, %v1829_v12 }
  0xad   :  { %729 = vmatmul.mubr.bf16.gmra.mxu0 %v1831_v13  ;;  %857 = vmatmul.mubr.bf16.gmra.mxu1 %v1832_v14 }
  0xf5   :  { %v610_v16 = vpop.f32.mrf.mxu0  ;;  %v738_v17 = vpop.f32.mrf.mxu1 }
  0xf6   :  { %v611_v20 = vadd.f32 %v2171_v15, %v610_v16  ;;  %v739_v21 = vadd.f32 %v2171_v15, %v738_v17 }
  0xf7   :  { %v612_v18 = vpop.f32.mrf.mxu0  ;;  %v740_v19 = vpop.f32.mrf.mxu1 }
  0xf8   :  { %v865_v28 = vmax.f32 %v611_v20, 0.0  ;;  %v897_v29 = vmax.f32 %v739_v21, 0.0 }
  0xf9   :  { %v613_v22 = vpop.f32.mrf.mxu0  ;;  %v741_v23 = vpop.f32.mrf.mxu1 }
  0xfa   :  { %v614_v24 = vadd.f32 %v2171_v15, %v613_v22  ;;  %v742_v25 = vadd.f32 %v2171_v15, %v741_v23 }
  0xfb   :  { %v615_v26 = vpop.f32.mrf.mxu0  ;;  %v743_v27 = vpop.f32.mrf.mxu1 }
  0xfc   :  { %v866_v30 = vmax.f32 %v614_v24, 0.0  ;;  %v898_v31 = vmax.f32 %v742_v25, 0.0 }
  0xfd   :  { %v618_v32 = vpop.f32.mrf.mxu0  ;;  %v746_v33 = vpop.f32.mrf.mxu1 }
  0xfe   :  { %v1506_v34 = vpack.c.bf16 %v866_v30, %v865_v28  ;;  %v1586_v35 = vpack.c.bf16 %v898_v31, %v897_v29  ;;  %v619_v38 = vadd.f32 %v2171_v15, %v618_v32  ;;  %v747_v39 = vadd.f32 %v2171_v15, %v746_v33 }
  0xff   :  { %v620_v36 = vpop.f32.mrf.mxu0  ;;  %v748_v37 = vpop.f32.mrf.mxu1 }
 0x100   :  { %1507 = vst [vmem:[#allocation2] sm:$0xff] %v1506_v34   ;;  %1678 = vst [vmem:[#allocation2 + $0x80] sm:$0xff] %v1586_v35   ;;  %v867_v46 = vmax.f32 %v619_v38, 0.0  ;;  %v899_v47 = vmax.f32 %v747_v39, 0.0 }
 0x101   :  { %v621_v40 = vpop.f32.mrf.mxu0  ;;  %v749_v41 = vpop.f32.mrf.mxu1 }
 0x102   :  { %v622_v42 = vadd.f32 %v2171_v15, %v621_v40  ;;  %v750_v43 = vadd.f32 %v2171_v15, %v749_v41 }
 0x103   :  { %v623_v44 = vpop.f32.mrf.mxu0  ;;  %v751_v45 = vpop.f32.mrf.mxu1 }
 0x104   :  { %v868_v48 = vmax.f32 %v622_v42, 0.0  ;;  %v900_v49 = vmax.f32 %v750_v43, 0.0 }
 0x105   :  { %v626_v50 = vpop.f32.mrf.mxu0  ;;  %v754_v51 = vpop.f32.mrf.mxu1 }
 0x106   :  { %v1511_v52 = vpack.c.bf16 %v868_v48, %v867_v46  ;;  %v1591_v53 = vpack.c.bf16 %v900_v49, %v899_v47  ;;  %v627_v56 = vadd.f32 %v2171_v15, %v626_v50  ;;  %v755_v57 = vadd.f32 %v2171_v15, %v754_v51 }
 0x107   :  { %v628_v54 = vpop.f32.mrf.mxu0  ;;  %v756_v55 = vpop.f32.mrf.mxu1 }
 0x108   :  { %1663 = vst [vmem:[#allocation2 + $0x8] sm:$0xff] %v1511_v52   ;;  %1679 = vst [vmem:[#allocation2 + $0x88] sm:$0xff] %v1591_v53   ;;  %v869_v0 = vmax.f32 %v627_v56, 0.0  ;;  %v901_v1 = vmax.f32 %v755_v57, 0.0 }
 0x109   :  { %v629_v58 = vpop.f32.mrf.mxu0  ;;  %v757_v59 = vpop.f32.mrf.mxu1 }
 0x10a   :  { %v630_v60 = vadd.f32 %v2171_v15, %v629_v58  ;;  %v758_v61 = vadd.f32 %v2171_v15, %v757_v59 }
 0x10b   :  { %v631_v62 = vpop.f32.mrf.mxu0  ;;  %v759_v63 = vpop.f32.mrf.mxu1 }
 0x10c   :  { %v870_v2 = vmax.f32 %v630_v60, 0.0  ;;  %v902_v3 = vmax.f32 %v758_v61, 0.0 }
 0x10d   :  { %v634_v4 = vpop.f32.mrf.mxu0  ;;  %v762_v5 = vpop.f32.mrf.mxu1 }
 0x10e   :  { %v1516_v6 = vpack.c.bf16 %v870_v2, %v869_v0  ;;  %v1596_v7 = vpack.c.bf16 %v902_v3, %v901_v1  ;;  %v635_v10 = vadd.f32 %v2171_v15, %v634_v4  ;;  %v763_v11 = vadd.f32 %v2171_v15, %v762_v5 }
 0x10f   :  { %v636_v8 = vpop.f32.mrf.mxu0  ;;  %v764_v9 = vpop.f32.mrf.mxu1 }
 0x110   :  { %1664 = vst [vmem:[#allocation2 + $0x10] sm:$0xff] %v1516_v6   ;;  %1680 = vst [vmem:[#allocation2 + $0x90] sm:$0xff] %v1596_v7   ;;  %v871_v19 = vmax.f32 %v635_v10, 0.0  ;;  %v903_v20 = vmax.f32 %v763_v11, 0.0 }
 0x111   :  { %v637_v12 = vpop.f32.mrf.mxu0  ;;  %v765_v13 = vpop.f32.mrf.mxu1 }
 0x112   :  { %v638_v14 = vadd.f32 %v2171_v15, %v637_v12  ;;  %v766_v16 = vadd.f32 %v2171_v15, %v765_v13 }
 0x113   :  { %v639_v17 = vpop.f32.mrf.mxu0  ;;  %v767_v18 = vpop.f32.mrf.mxu1 }
 0x114   :  { %v872_v21 = vmax.f32 %v638_v14, 0.0  ;;  %v904_v22 = vmax.f32 %v766_v16, 0.0 }
 0x115   :  { %v642_v23 = vpop.f32.mrf.mxu0  ;;  %v770_v24 = vpop.f32.mrf.mxu1 }
 0x116   :  { %v1521_v25 = vpack.c.bf16 %v872_v21, %v871_v19  ;;  %v1601_v26 = vpack.c.bf16 %v904_v22, %v903_v20  ;;  %v643_v29 = vadd.f32 %v2171_v15, %v642_v23  ;;  %v771_v30 = vadd.f32 %v2171_v15, %v770_v24 }
 0x117   :  { %v644_v27 = vpop.f32.mrf.mxu0  ;;  %v772_v28 = vpop.f32.mrf.mxu1 }
 0x118   :  { %1665 = vst [vmem:[#allocation2 + $0x18] sm:$0xff] %v1521_v25   ;;  %1681 = vst [vmem:[#allocation2 + $0x98] sm:$0xff] %v1601_v26   ;;  %v873_v37 = vmax.f32 %v643_v29, 0.0  ;;  %v905_v38 = vmax.f32 %v771_v30, 0.0 }
 0x119   :  { %v645_v31 = vpop.f32.mrf.mxu0  ;;  %v773_v32 = vpop.f32.mrf.mxu1 }
 0x11a   :  { %v646_v33 = vadd.f32 %v2171_v15, %v645_v31  ;;  %v774_v34 = vadd.f32 %v2171_v15, %v773_v32 }
 0x11b   :  { %v647_v35 = vpop.f32.mrf.mxu0  ;;  %v775_v36 = vpop.f32.mrf.mxu1 }
 0x11c   :  { %v874_v39 = vmax.f32 %v646_v33, 0.0  ;;  %v906_v40 = vmax.f32 %v774_v34, 0.0 }
 0x11d   :  { %v650_v41 = vpop.f32.mrf.mxu0  ;;  %v778_v42 = vpop.f32.mrf.mxu1 }
 0x11e   :  { %v1526_v43 = vpack.c.bf16 %v874_v39, %v873_v37  ;;  %v1606_v44 = vpack.c.bf16 %v906_v40, %v905_v38  ;;  %v651_v47 = vadd.f32 %v2171_v15, %v650_v41  ;;  %v779_v48 = vadd.f32 %v2171_v15, %v778_v42 }
 0x11f   :  { %v652_v45 = vpop.f32.mrf.mxu0  ;;  %v780_v46 = vpop.f32.mrf.mxu1 }
 0x120   :  { %1666 = vst [vmem:[#allocation2 + $0x20] sm:$0xff] %v1526_v43   ;;  %1682 = vst [vmem:[#allocation2 + $0xa0] sm:$0xff] %v1606_v44   ;;  %v875_v55 = vmax.f32 %v651_v47, 0.0  ;;  %v907_v56 = vmax.f32 %v779_v48, 0.0 }
 0x121   :  { %v653_v49 = vpop.f32.mrf.mxu0  ;;  %v781_v50 = vpop.f32.mrf.mxu1 }
 0x122   :  { %v654_v51 = vadd.f32 %v2171_v15, %v653_v49  ;;  %v782_v52 = vadd.f32 %v2171_v15, %v781_v50 }
 0x123   :  { %v655_v53 = vpop.f32.mrf.mxu0  ;;  %v783_v54 = vpop.f32.mrf.mxu1 }
 0x124   :  { %v876_v57 = vmax.f32 %v654_v51, 0.0  ;;  %v908_v58 = vmax.f32 %v782_v52, 0.0 }
 0x125   :  { %v658_v59 = vpop.f32.mrf.mxu0  ;;  %v786_v60 = vpop.f32.mrf.mxu1 }
 0x126   :  { %v1531_v61 = vpack.c.bf16 %v876_v57, %v875_v55  ;;  %v1611_v62 = vpack.c.bf16 %v908_v58, %v907_v56  ;;  %v659_v1 = vadd.f32 %v2171_v15, %v658_v59  ;;  %v787_v2 = vadd.f32 %v2171_v15, %v786_v60 }
 0x127   :  { %v660_v63 = vpop.f32.mrf.mxu0  ;;  %v788_v0 = vpop.f32.mrf.mxu1 }
 0x128   :  { %1667 = vst [vmem:[#allocation2 + $0x28] sm:$0xff] %v1531_v61   ;;  %1683 = vst [vmem:[#allocation2 + $0xa8] sm:$0xff] %v1611_v62   ;;  %v877_v9 = vmax.f32 %v659_v1, 0.0  ;;  %v909_v10 = vmax.f32 %v787_v2, 0.0 }
 0x129   :  { %v661_v3 = vpop.f32.mrf.mxu0  ;;  %v789_v4 = vpop.f32.mrf.mxu1 }
 0x12a   :  { %v662_v5 = vadd.f32 %v2171_v15, %v661_v3  ;;  %v790_v6 = vadd.f32 %v2171_v15, %v789_v4 }
 0x12b   :  { %v663_v7 = vpop.f32.mrf.mxu0  ;;  %v791_v8 = vpop.f32.mrf.mxu1 }
 0x12c   :  { %v878_v11 = vmax.f32 %v662_v5, 0.0  ;;  %v910_v12 = vmax.f32 %v790_v6, 0.0 }
 0x12d   :  { %v666_v13 = vpop.f32.mrf.mxu0  ;;  %v794_v14 = vpop.f32.mrf.mxu1 }
 0x12e   :  { %v1536_v16 = vpack.c.bf16 %v878_v11, %v877_v9  ;;  %v1616_v17 = vpack.c.bf16 %v910_v12, %v909_v10  ;;  %v667_v20 = vadd.f32 %v2171_v15, %v666_v13  ;;  %v795_v21 = vadd.f32 %v2171_v15, %v794_v14 }
 0x12f   :  { %v668_v18 = vpop.f32.mrf.mxu0  ;;  %v796_v19 = vpop.f32.mrf.mxu1 }
 0x130   :  { %1668 = vst [vmem:[#allocation2 + $0x30] sm:$0xff] %v1536_v16   ;;  %1684 = vst [vmem:[#allocation2 + $0xb0] sm:$0xff] %v1616_v17   ;;  %v879_v28 = vmax.f32 %v667_v20, 0.0  ;;  %v911_v29 = vmax.f32 %v795_v21, 0.0 }
 0x131   :  { %v669_v22 = vpop.f32.mrf.mxu0  ;;  %v797_v23 = vpop.f32.mrf.mxu1 }
 0x132   :  { %v670_v24 = vadd.f32 %v2171_v15, %v669_v22  ;;  %v798_v25 = vadd.f32 %v2171_v15, %v797_v23 }
 0x133   :  { %v671_v26 = vpop.f32.mrf.mxu0  ;;  %v799_v27 = vpop.f32.mrf.mxu1 }
 0x134   :  { %v880_v30 = vmax.f32 %v670_v24, 0.0  ;;  %v912_v31 = vmax.f32 %v798_v25, 0.0 }
 0x135   :  { %v674_v32 = vpop.f32.mrf.mxu0  ;;  %v802_v33 = vpop.f32.mrf.mxu1 }
 0x136   :  { %v1541_v34 = vpack.c.bf16 %v880_v30, %v879_v28  ;;  %v1621_v35 = vpack.c.bf16 %v912_v31, %v911_v29  ;;  %v675_v38 = vadd.f32 %v2171_v15, %v674_v32  ;;  %v803_v39 = vadd.f32 %v2171_v15, %v802_v33 }
 0x137   :  { %v676_v36 = vpop.f32.mrf.mxu0  ;;  %v804_v37 = vpop.f32.mrf.mxu1 }
 0x138   :  { %1669 = vst [vmem:[#allocation2 + $0x38] sm:$0xff] %v1541_v34   ;;  %1685 = vst [vmem:[#allocation2 + $0xb8] sm:$0xff] %v1621_v35   ;;  %v881_v46 = vmax.f32 %v675_v38, 0.0  ;;  %v913_v47 = vmax.f32 %v803_v39, 0.0 }
 0x139   :  { %v677_v40 = vpop.f32.mrf.mxu0  ;;  %v805_v41 = vpop.f32.mrf.mxu1 }
 0x13a   :  { %v678_v42 = vadd.f32 %v2171_v15, %v677_v40  ;;  %v806_v43 = vadd.f32 %v2171_v15, %v805_v41 }
 0x13b   :  { %v679_v44 = vpop.f32.mrf.mxu0  ;;  %v807_v45 = vpop.f32.mrf.mxu1 }
 0x13c   :  { %v882_v48 = vmax.f32 %v678_v42, 0.0  ;;  %v914_v49 = vmax.f32 %v806_v43, 0.0 }
 0x13d   :  { %v682_v50 = vpop.f32.mrf.mxu0  ;;  %v810_v51 = vpop.f32.mrf.mxu1 }
 0x13e   :  { %v1546_v52 = vpack.c.bf16 %v882_v48, %v881_v46  ;;  %v1626_v53 = vpack.c.bf16 %v914_v49, %v913_v47  ;;  %v683_v56 = vadd.f32 %v2171_v15, %v682_v50  ;;  %v811_v57 = vadd.f32 %v2171_v15, %v810_v51 }
 0x13f   :  { %v684_v54 = vpop.f32.mrf.mxu0  ;;  %v812_v55 = vpop.f32.mrf.mxu1 }
 0x140   :  { %1670 = vst [vmem:[#allocation2 + $0x40] sm:$0xff] %v1546_v52   ;;  %1686 = vst [vmem:[#allocation2 + $0xc0] sm:$0xff] %v1626_v53   ;;  %v883_v0 = vmax.f32 %v683_v56, 0.0  ;;  %v915_v1 = vmax.f32 %v811_v57, 0.0 }
 0x141   :  { %v685_v58 = vpop.f32.mrf.mxu0  ;;  %v813_v59 = vpop.f32.mrf.mxu1 }
 0x142   :  { %v686_v60 = vadd.f32 %v2171_v15, %v685_v58  ;;  %v814_v61 = vadd.f32 %v2171_v15, %v813_v59 }
 0x143   :  { %v687_v62 = vpop.f32.mrf.mxu0  ;;  %v815_v63 = vpop.f32.mrf.mxu1 }
 0x144   :  { %v884_v2 = vmax.f32 %v686_v60, 0.0  ;;  %v916_v3 = vmax.f32 %v814_v61, 0.0 }
 0x145   :  { %v690_v4 = vpop.f32.mrf.mxu0  ;;  %v818_v5 = vpop.f32.mrf.mxu1 }
 0x146   :  { %v1551_v6 = vpack.c.bf16 %v884_v2, %v883_v0  ;;  %v1631_v7 = vpack.c.bf16 %v916_v3, %v915_v1  ;;  %v691_v10 = vadd.f32 %v2171_v15, %v690_v4  ;;  %v819_v11 = vadd.f32 %v2171_v15, %v818_v5 }
 0x147   :  { %v692_v8 = vpop.f32.mrf.mxu0  ;;  %v820_v9 = vpop.f32.mrf.mxu1 }
 0x148   :  { %1671 = vst [vmem:[#allocation2 + $0x48] sm:$0xff] %v1551_v6   ;;  %1687 = vst [vmem:[#allocation2 + $0xc8] sm:$0xff] %v1631_v7   ;;  %v885_v19 = vmax.f32 %v691_v10, 0.0  ;;  %v917_v20 = vmax.f32 %v819_v11, 0.0 }
 0x149   :  { %v693_v12 = vpop.f32.mrf.mxu0  ;;  %v821_v13 = vpop.f32.mrf.mxu1 }
 0x14a   :  { %v694_v14 = vadd.f32 %v2171_v15, %v693_v12  ;;  %v822_v16 = vadd.f32 %v2171_v15, %v821_v13 }
 0x14b   :  { %v695_v17 = vpop.f32.mrf.mxu0  ;;  %v823_v18 = vpop.f32.mrf.mxu1 }
 0x14c   :  { %v886_v21 = vmax.f32 %v694_v14, 0.0  ;;  %v918_v22 = vmax.f32 %v822_v16, 0.0 }
 0x14d   :  { %v698_v23 = vpop.f32.mrf.mxu0  ;;  %v826_v24 = vpop.f32.mrf.mxu1 }
 0x14e   :  { %v1556_v25 = vpack.c.bf16 %v886_v21, %v885_v19  ;;  %v1636_v26 = vpack.c.bf16 %v918_v22, %v917_v20  ;;  %v699_v29 = vadd.f32 %v2171_v15, %v698_v23  ;;  %v827_v30 = vadd.f32 %v2171_v15, %v826_v24 }
 0x14f   :  { %v700_v27 = vpop.f32.mrf.mxu0  ;;  %v828_v28 = vpop.f32.mrf.mxu1 }
 0x150   :  { %1672 = vst [vmem:[#allocation2 + $0x50] sm:$0xff] %v1556_v25   ;;  %1688 = vst [vmem:[#allocation2 + $0xd0] sm:$0xff] %v1636_v26   ;;  %v887_v37 = vmax.f32 %v699_v29, 0.0  ;;  %v919_v38 = vmax.f32 %v827_v30, 0.0 }
 0x151   :  { %v701_v31 = vpop.f32.mrf.mxu0  ;;  %v829_v32 = vpop.f32.mrf.mxu1 }
 0x152   :  { %v702_v33 = vadd.f32 %v2171_v15, %v701_v31  ;;  %v830_v34 = vadd.f32 %v2171_v15, %v829_v32 }
 0x153   :  { %v703_v35 = vpop.f32.mrf.mxu0  ;;  %v831_v36 = vpop.f32.mrf.mxu1 }
 0x154   :  { %v888_v39 = vmax.f32 %v702_v33, 0.0  ;;  %v920_v40 = vmax.f32 %v830_v34, 0.0 }
 0x155   :  { %v706_v41 = vpop.f32.mrf.mxu0  ;;  %v834_v42 = vpop.f32.mrf.mxu1 }
 0x156   :  { %v1561_v43 = vpack.c.bf16 %v888_v39, %v887_v37  ;;  %v1641_v44 = vpack.c.bf16 %v920_v40, %v919_v38  ;;  %v707_v47 = vadd.f32 %v2171_v15, %v706_v41  ;;  %v835_v48 = vadd.f32 %v2171_v15, %v834_v42 }
 0x157   :  { %v708_v45 = vpop.f32.mrf.mxu0  ;;  %v836_v46 = vpop.f32.mrf.mxu1 }
 0x158   :  { %1673 = vst [vmem:[#allocation2 + $0x58] sm:$0xff] %v1561_v43   ;;  %1689 = vst [vmem:[#allocation2 + $0xd8] sm:$0xff] %v1641_v44   ;;  %v889_v55 = vmax.f32 %v707_v47, 0.0  ;;  %v921_v56 = vmax.f32 %v835_v48, 0.0 }
 0x159   :  { %v709_v49 = vpop.f32.mrf.mxu0  ;;  %v837_v50 = vpop.f32.mrf.mxu1 }
 0x15a   :  { %v710_v51 = vadd.f32 %v2171_v15, %v709_v49  ;;  %v838_v52 = vadd.f32 %v2171_v15, %v837_v50 }
 0x15b   :  { %v711_v53 = vpop.f32.mrf.mxu0  ;;  %v839_v54 = vpop.f32.mrf.mxu1 }
 0x15c   :  { %v890_v57 = vmax.f32 %v710_v51, 0.0  ;;  %v922_v58 = vmax.f32 %v838_v52, 0.0 }
 0x15d   :  { %v714_v59 = vpop.f32.mrf.mxu0  ;;  %v842_v60 = vpop.f32.mrf.mxu1 }
 0x15e   :  { %v1566_v61 = vpack.c.bf16 %v890_v57, %v889_v55  ;;  %v1646_v62 = vpack.c.bf16 %v922_v58, %v921_v56  ;;  %v715_v1 = vadd.f32 %v2171_v15, %v714_v59  ;;  %v843_v2 = vadd.f32 %v2171_v15, %v842_v60 }
 0x15f   :  { %v716_v63 = vpop.f32.mrf.mxu0  ;;  %v844_v0 = vpop.f32.mrf.mxu1 }
 0x160   :  { %1674 = vst [vmem:[#allocation2 + $0x60] sm:$0xff] %v1566_v61   ;;  %1690 = vst [vmem:[#allocation2 + $0xe0] sm:$0xff] %v1646_v62   ;;  %v891_v9 = vmax.f32 %v715_v1, 0.0  ;;  %v923_v10 = vmax.f32 %v843_v2, 0.0 }
 0x161   :  { %v717_v3 = vpop.f32.mrf.mxu0  ;;  %v845_v4 = vpop.f32.mrf.mxu1 }
 0x162   :  { %v718_v5 = vadd.f32 %v2171_v15, %v717_v3  ;;  %v846_v6 = vadd.f32 %v2171_v15, %v845_v4 }
 0x163   :  { %v719_v7 = vpop.f32.mrf.mxu0  ;;  %v847_v8 = vpop.f32.mrf.mxu1 }
 0x164   :  { %v892_v11 = vmax.f32 %v718_v5, 0.0  ;;  %v924_v12 = vmax.f32 %v846_v6, 0.0 }
 0x165   :  { %v722_v13 = vpop.f32.mrf.mxu0  ;;  %v850_v14 = vpop.f32.mrf.mxu1 }
 0x166   :  { %v1571_v16 = vpack.c.bf16 %v892_v11, %v891_v9  ;;  %v1651_v17 = vpack.c.bf16 %v924_v12, %v923_v10  ;;  %v723_v20 = vadd.f32 %v2171_v15, %v722_v13  ;;  %v851_v21 = vadd.f32 %v2171_v15, %v850_v14 }
 0x167   :  { %v724_v18 = vpop.f32.mrf.mxu0  ;;  %v852_v19 = vpop.f32.mrf.mxu1 }
 0x168   :  { %1675 = vst [vmem:[#allocation2 + $0x68] sm:$0xff] %v1571_v16   ;;  %1691 = vst [vmem:[#allocation2 + $0xe8] sm:$0xff] %v1651_v17   ;;  %v893_v28 = vmax.f32 %v723_v20, 0.0  ;;  %v925_v29 = vmax.f32 %v851_v21, 0.0 }
 0x169   :  { %v725_v22 = vpop.f32.mrf.mxu0  ;;  %v853_v23 = vpop.f32.mrf.mxu1 }
 0x16a   :  { %v726_v24 = vadd.f32 %v2171_v15, %v725_v22  ;;  %v854_v25 = vadd.f32 %v2171_v15, %v853_v23 }
 0x16b   :  { %v727_v26 = vpop.f32.mrf.mxu0  ;;  %v855_v27 = vpop.f32.mrf.mxu1 }
 0x16c   :  { %v894_v30 = vmax.f32 %v726_v24, 0.0  ;;  %v926_v31 = vmax.f32 %v854_v25, 0.0 }
 0x16d   :  { %v730_v32 = vpop.f32.mrf.mxu0  ;;  %v858_v33 = vpop.f32.mrf.mxu1 }
 0x16e   :  { %v1576_v34 = vpack.c.bf16 %v894_v30, %v893_v28  ;;  %v1656_v35 = vpack.c.bf16 %v926_v31, %v925_v29  ;;  %v731_v38 = vadd.f32 %v2171_v15, %v730_v32  ;;  %v859_v39 = vadd.f32 %v2171_v15, %v858_v33 }
 0x16f   :  { %v732_v36 = vpop.f32.mrf.mxu0  ;;  %v860_v37 = vpop.f32.mrf.mxu1 }
 0x170   :  { %1676 = vst [vmem:[#allocation2 + $0x70] sm:$0xff] %v1576_v34   ;;  %1692 = vst [vmem:[#allocation2 + $0xf0] sm:$0xff] %v1656_v35   ;;  %v895_v46 = vmax.f32 %v731_v38, 0.0  ;;  %v927_v47 = vmax.f32 %v859_v39, 0.0 }
 0x171   :  { %v733_v40 = vpop.f32.mrf.mxu0  ;;  %v861_v41 = vpop.f32.mrf.mxu1 }
 0x172   :  { %v734_v42 = vadd.f32 %v2171_v15, %v733_v40  ;;  %v862_v43 = vadd.f32 %v2171_v15, %v861_v41 }
 0x173   :  { %v735_v44 = vpop.f32.mrf.mxu0  ;;  %v863_v45 = vpop.f32.mrf.mxu1 }
 0x174   :  { %v896_v48 = vmax.f32 %v734_v42, 0.0  ;;  %v928_v49 = vmax.f32 %v862_v43, 0.0 }
 0x176   :  { %v1581_v50 = vpack.c.bf16 %v896_v48, %v895_v46  ;;  %v1661_v51 = vpack.c.bf16 %v928_v49, %v927_v47 }
 0x178   :  { %1677 = vst [vmem:[#allocation2 + $0x78] sm:$0xff] %v1581_v50   ;;  %1693 = vst [vmem:[#allocation2 + $0xf8] sm:$0xff] %v1661_v51  }
 0x179   :  { %1844 = shalt.err (!%p1841_p4)
}
 0x17a   :  { %s1857_s29 = smov 64   ;;  %s1858_s30 = smov 4  }
 0x17b   :  { %1260 = dma.vmem_to_hbm [thread:$0]  %s1255_s2, 4096, %s2243_s3, [#allocation3], %s1857_s29, %s1857_s29, %s1858_s30  }
 0x17c   :  { %1853 = dma.done.wait [#allocation3], 4096  }
 0x17d   :  { %1854 = vsyncadd [#allocation3], 4294963200 }
 0x17e   :  { %1264 = vsyncpa [#allocation3], 1 }

</bundles_post_ra>
